<compile_context>
chip_gen: v5e
topology: v5e:2x2
jax: 0.10.0
libtpu: 0.0.40
codegen_flags: <defaults>
</compile_context>

<pallas_src>
import functools

import jax
import jax.numpy as jnp
from jax.experimental import pallas as pl
from jax.experimental.pallas import tpu as pltpu

EMBED_DIM = 32
NUM_HEADS = 4
HEAD_DIM = EMBED_DIM // NUM_HEADS
NUM_KEYS = EMBED_DIM           # S: one key per row of expert_keys
NUM_TASKS = 6
TOP_K = 2
NOISE_EPS = 0.01

B_PAD = 8                      # batch padded to 8 sublanes
LANES = 128                    # lane-dense output width (== NUM_HEADS * NUM_KEYS)


def _moe_gate_kernel(tid_ref,       # SMEM (B_PAD,) int32      -- scalar prefetch
                     qtab_ref,      # VMEM (B_PAD, EMBED_DIM)  -- per-task q rows (scale+bias folded)
                     kbd_ref,       # VMEM (EMBED_DIM, LANES)  -- block-diagonal per-head keys^T
                     wgn_ref,       # VMEM (EMBED_DIM, 2N)     -- [Wg^T+bg | Wn^T+bn]
                     noise_ref,     # VMEM (B_PAD, LANES)      -- noise in lanes [:N]
                     out_ref,       # VMEM (2*B_PAD, LANES)    -- rows 0..7 gates, row 8 load
                     q_buf,         # VMEM scratch (B_PAD, EMBED_DIM)
                     *, batch, n_experts):
    # ---- in-kernel embedding/q gather: taskID scalars live in SMEM (scalar prefetch) ----
    for b in range(B_PAD):
        tid = tid_ref[b]
        q_buf[pl.ds(b, 1), :] = qtab_ref[pl.ds(tid, 1), :]
    q = q_buf[...]                                                     # (8, 32)

    # ---- attention scores for all 4 heads in ONE MXU call (block-diagonal keys) ----
    s_all = jnp.dot(q, kbd_ref[...], preferred_element_type=jnp.float32)   # (8, 128)

    # ---- per-head softmax (shared global max; softmax is shift-invariant), head average ----
    m_glob = jnp.max(s_all, axis=-1, keepdims=True)                    # (8, 1)
    e_all = jnp.exp(s_all - m_glob)                                    # (8, 128)
    attn = jnp.zeros((B_PAD, NUM_KEYS), jnp.float32)
    for h in range(NUM_HEADS):
        e_h = e_all[:, h * NUM_KEYS:(h + 1) * NUM_KEYS]                # static 32-lane slice
        attn = attn + e_h / jnp.sum(e_h, axis=-1, keepdims=True)       # exact div (pre-selection)
    attn = attn * (1.0 / NUM_HEADS)                                    # (8, 32)

    # ---- second softmax -> expert_weight (rows sum to 1; biases of the heads are folded) ----
    a = attn - jnp.max(attn, axis=-1, keepdims=True)
    ea = jnp.exp(a)
    ew = ea / jnp.sum(ea, axis=-1, keepdims=True)                      # (8, 32)

    # ---- fused gating heads: [clean | raw_noise] in ONE matmul ----
    gn = jnp.dot(ew, wgn_ref[...], preferred_element_type=jnp.float32)  # (8, 2N)
    clean = gn[:, :n_experts]
    raw = gn[:, n_experts:2 * n_experts]
    stddev = jax.nn.softplus(raw) + NOISE_EPS
    logits = clean + noise_ref[...][:, :n_experts] * stddev            # (8, N)

    # ---- top-2 selection, softmax over the 2 selected logits ----
    col = jax.lax.broadcasted_iota(jnp.int32, logits.shape, 1)
    big = jnp.int32(2 ** 30)
    m1 = jnp.max(logits, axis=-1, keepdims=True)
    i1 = jnp.min(jnp.where(logits == m1, col, big), axis=-1, keepdims=True)
    masked = jnp.where(col == i1, -jnp.inf, logits)
    m2 = jnp.max(masked, axis=-1, keepdims=True)
    i2 = jnp.min(jnp.where(masked == m2, col, big), axis=-1, keepdims=True)

    e2 = jnp.exp(m2 - m1)                                              # m1 >= m2, safe
    inv = pl.reciprocal(1.0 + e2, approx=True)                         # post-selection: approx OK
    g1 = inv
    g2 = e2 * inv

    # ---- scatter into a lane-dense (8, 128) slab; zero the padded batch rows ----
    lane = jax.lax.broadcasted_iota(jnp.int32, (B_PAD, LANES), 1)
    row = jax.lax.broadcasted_iota(jnp.int32, (B_PAD, LANES), 0)
    gates = jnp.where(lane == i1, g1, 0.0) + jnp.where(lane == i2, g2, 0.0)
    gates = jnp.where(row < batch, gates, 0.0)

    load = jnp.sum(gates, axis=0, keepdims=True)                       # (1, 128)

    # single merged output: rows 0..7 gates, rows 8.. load (row 8 is read back)
    out_ref[...] = jnp.concatenate(
        [gates, jnp.broadcast_to(load, (B_PAD, LANES))], axis=0)


def pack_params(p):
    """One-time parameter packing / folding (batch-independent, done outside the call)."""
    scale = 1.0 / jnp.sqrt(jnp.float32(HEAD_DIM))

    # Embedding + q-projection + attention scale + bias folded into one per-task table.
    q_table = p["embed_table"] @ (p["wq"] * scale).T + p["bq"] * scale         # (6, 32)
    q_table = jnp.zeros((B_PAD, EMBED_DIM), jnp.float32).at[:NUM_TASKS].set(q_table)

    # k-projection is batch-independent -> hoist; block-diagonal layout so all heads'
    # scores come from a single (B,32)x(32,128) matmul.
    k_proj = p["expert_keys"] @ p["wk"].T + p["bk"]                            # (32, 32)
    kbd = jnp.zeros((EMBED_DIM, NUM_HEADS * NUM_KEYS), jnp.float32)
    for h in range(NUM_HEADS):
        kbd = kbd.at[h * HEAD_DIM:(h + 1) * HEAD_DIM,
                     h * NUM_KEYS:(h + 1) * NUM_KEYS].set(
                         k_proj[:, h * HEAD_DIM:(h + 1) * HEAD_DIM].T)

    # Gate + noise heads fused; biases folded exactly (expert_weight rows sum to 1).
    wgn = jnp.concatenate([p["wg"].T + p["bg"], p["wn"].T + p["bn"]], axis=1)  # (32, 2N)
    n_experts = p["wg"].shape[0]
    return {"q_table": q_table, "kbd": kbd, "wgn": wgn, "n_experts": n_experts}


def moe_gate_forward(taskID, packed, noise, expert_nums):
    """Returns (gates (B, expert_nums), load (expert_nums,)) like MoEGate_task.forward."""
    B = taskID.shape[0]
    assert B <= B_PAD  # TODO(synk): tile batch over a ("parallel",) grid for B > 8 (v7x megacore).

    tid = jnp.zeros((B_PAD,), jnp.int32).at[:B].set(taskID.astype(jnp.int32))
    if noise.shape != (B_PAD, LANES):   # accept either padded or raw (B, N) noise
        noise = jnp.zeros((B_PAD, LANES), jnp.float32).at[:noise.shape[0],
                                                          :noise.shape[1]].set(noise)

    kernel = functools.partial(_moe_gate_kernel, batch=B, n_experts=expert_nums)
    out = pl.pallas_call(
        kernel,
        out_shape=jax.ShapeDtypeStruct((2 * B_PAD, LANES), jnp.float32),
        grid_spec=pltpu.PrefetchScalarGridSpec(
            num_scalar_prefetch=1,                    # taskID -> SMEM
            grid=(1,),
            in_specs=[
                pl.BlockSpec((B_PAD, EMBED_DIM), lambda i, *_: (0, 0)),     # q_table
                pl.BlockSpec((EMBED_DIM, LANES), lambda i, *_: (0, 0)),     # k_bd
                pl.BlockSpec((EMBED_DIM, 2 * expert_nums), lambda i, *_: (0, 0)),  # w_gn
                pl.BlockSpec((B_PAD, LANES), lambda i, *_: (0, 0)),         # noise
            ],
            out_specs=pl.BlockSpec((2 * B_PAD, LANES), lambda i, *_: (0, 0)),
            scratch_shapes=[pltpu.VMEM((B_PAD, EMBED_DIM), jnp.float32)],
        ),
        compiler_params=pltpu.CompilerParams(dimension_semantics=("arbitrary",)),
    )(tid, packed["q_table"], packed["kbd"], packed["wgn"], noise)

    gates = out[:B, :expert_nums]
    load = out[B_PAD, :expert_nums]
    return gates, load


def _reference(taskID, p, noise, expert_nums):
    """Pure-JAX mirror of the PyTorch forward (same deterministic noise)."""
    te = p["embed_table"][taskID]
    q = te @ p["wq"].T + p["bq"]
    k = p["expert_keys"] @ p["wk"].T + p["bk"]
    B = te.shape[0]
    qh = q.reshape(B, NUM_HEADS, HEAD_DIM) / jnp.sqrt(jnp.float32(HEAD_DIM))
    kh = k.reshape(NUM_KEYS, NUM_HEADS, HEAD_DIM)
    s = jnp.einsum("bhd,shd->bhs", qh, kh)
    attn_weights = jax.nn.softmax(s, axis=-1).mean(axis=1)
    expert_weight = jax.nn.softmax(attn_weights, axis=-1)
    clean = expert_weight @ p["wg"].T + p["bg"]
    raw = expert_weight @ p["wn"].T + p["bn"]
    stddev = jax.nn.softplus(raw) + NOISE_EPS
    logits = clean + noise * stddev
    top_vals, top_idx = jax.lax.top_k(logits, TOP_K)
    top_gates = jax.nn.softmax(top_vals, axis=-1)
    gates = jnp.zeros_like(logits).at[jnp.arange(B)[:, None], top_idx].set(top_gates)
    return gates, gates.sum(0)


if __name__ == "__main__":
    expert_nums = 8
    B = 4

    key = jax.random.PRNGKey(0)
    ks = jax.random.split(key, 11)
    params = {
        "embed_table": jax.random.normal(ks[0], (NUM_TASKS, EMBED_DIM), jnp.float32),
        "wq": 0.1 * jax.random.normal(ks[1], (EMBED_DIM, EMBED_DIM), jnp.float32),
        "bq": 0.1 * jax.random.normal(ks[2], (1, EMBED_DIM), jnp.float32),
        "wk": 0.1 * jax.random.normal(ks[3], (EMBED_DIM, EMBED_DIM), jnp.float32),
        "bk": 0.1 * jax.random.normal(ks[4], (1, EMBED_DIM), jnp.float32),
        "expert_keys": jax.random.normal(ks[5], (EMBED_DIM, EMBED_DIM), jnp.float32),
        "wg": 0.2 * jax.random.normal(ks[6], (expert_nums, EMBED_DIM), jnp.float32),
        "bg": 0.1 * jax.random.normal(ks[7], (1, expert_nums), jnp.float32),
        "wn": 0.2 * jax.random.normal(ks[8], (expert_nums, EMBED_DIM), jnp.float32),
        "bn": 0.1 * jax.random.normal(ks[9], (1, expert_nums), jnp.float32),
    }

    taskID = jnp.array([2, 2, 1, 1], dtype=jnp.int32)      # as in the module docstring
    # Deterministic stand-in for torch.randn_like (train=True path); generated directly at
    # the kernel's padded (8, 128) layout so the call does not need a per-step pad op.
    noise_full = jax.random.normal(ks[10], (B_PAD, LANES), jnp.float32)
    noise = noise_full[:B, :expert_nums]                   # the values the math actually uses

    packed = pack_params(params)                           # one-time weight folding/packing
    gates, load = moe_gate_forward(taskID, packed, noise_full, expert_nums)
    jax.block_until_ready((gates, load))

    ref_gates, ref_load = _reference(taskID, params, noise, expert_nums)
    assert gates.shape == (B, expert_nums) and load.shape == (expert_nums,)
    assert jnp.allclose(gates, ref_gates, atol=2e-2), "gates mismatch vs reference"
    assert jnp.allclose(load, ref_load, atol=2e-2), "load mismatch vs reference"

    print("KERNEL_OK")
</pallas_src>

<mosaic_0001>
module attributes {stable_mosaic.version = 11 : i64} {
  func.func @_moe_gate_kernel(%arg0: i32, %arg1: memref<8xi32, #tpu.memory_space<smem>>, %arg2: memref<8x32xf32, #tpu.memory_space<vmem>>, %arg3: memref<32x128xf32, #tpu.memory_space<vmem>>, %arg4: memref<32x16xf32, #tpu.memory_space<vmem>>, %arg5: memref<8x128xf32, #tpu.memory_space<vmem>>, %arg6: memref<16x128xf32, #tpu.memory_space<vmem>>, %arg7: memref<8x32xf32, #tpu.memory_space<vmem>>) attributes {dimension_semantics = [#tpu.dimension_semantics<arbitrary>], iteration_bounds = array<i64: 1>, scalar_prefetch = 1 : i64, scratch_operands = 1 : i64, tpu.core_type = #tpu.core_type<tc>, window_params = [{pipeline_mode = #tpu.pipeline_mode<synchronous>, transform_indices = @transform_0, window_bounds = array<i64: 8, 32>}, {pipeline_mode = #tpu.pipeline_mode<synchronous>, transform_indices = @transform_1, window_bounds = array<i64: 32, 128>}, {pipeline_mode = #tpu.pipeline_mode<synchronous>, transform_indices = @transform_2, window_bounds = array<i64: 32, 16>}, {pipeline_mode = #tpu.pipeline_mode<synchronous>, transform_indices = @transform_3, window_bounds = array<i64: 8, 128>}, {pipeline_mode = #tpu.pipeline_mode<synchronous>, transform_indices = @transform_4, window_bounds = array<i64: 16, 128>}]} {
    %c0 = arith.constant 0 : index
    %0 = memref.load %arg1[%c0] : memref<8xi32, #tpu.memory_space<smem>>
    %1 = arith.index_cast %0 : i32 to index
    %c0_0 = arith.constant 0 : index
    %2 = vector.load %arg2[%1, %c0_0] : memref<8x32xf32, #tpu.memory_space<vmem>>, vector<1x32xf32>
    %c0_1 = arith.constant 0 : index
    %c0_2 = arith.constant 0 : index
    %3 = vector.load %arg7[%c0_1, %c0_2] : memref<8x32xf32, #tpu.memory_space<vmem>>, vector<1x32xf32>
    tpu.vector_store %arg7[%c0_1, %c0_2], %2 {strides = array<i32>} : memref<8x32xf32, #tpu.memory_space<vmem>>, vector<1x32xf32>,
    %c1 = arith.constant 1 : index
    %4 = memref.load %arg1[%c1] : memref<8xi32, #tpu.memory_space<smem>>
    %5 = arith.index_cast %4 : i32 to index
    %c0_3 = arith.constant 0 : index
    %6 = vector.load %arg2[%5, %c0_3] : memref<8x32xf32, #tpu.memory_space<vmem>>, vector<1x32xf32>
    %c1_4 = arith.constant 1 : index
    %c0_5 = arith.constant 0 : index
    %7 = vector.load %arg7[%c1_4, %c0_5] : memref<8x32xf32, #tpu.memory_space<vmem>>, vector<1x32xf32>
    tpu.vector_store %arg7[%c1_4, %c0_5], %6 {strides = array<i32>} : memref<8x32xf32, #tpu.memory_space<vmem>>, vector<1x32xf32>,
    %c2 = arith.constant 2 : index
    %8 = memref.load %arg1[%c2] : memref<8xi32, #tpu.memory_space<smem>>
    %9 = arith.index_cast %8 : i32 to index
    %c0_6 = arith.constant 0 : index
    %10 = vector.load %arg2[%9, %c0_6] : memref<8x32xf32, #tpu.memory_space<vmem>>, vector<1x32xf32>
    %c2_7 = arith.constant 2 : index
    %c0_8 = arith.constant 0 : index
    %11 = vector.load %arg7[%c2_7, %c0_8] : memref<8x32xf32, #tpu.memory_space<vmem>>, vector<1x32xf32>
    tpu.vector_store %arg7[%c2_7, %c0_8], %10 {strides = array<i32>} : memref<8x32xf32, #tpu.memory_space<vmem>>, vector<1x32xf32>,
    %c3 = arith.constant 3 : index
    %12 = memref.load %arg1[%c3] : memref<8xi32, #tpu.memory_space<smem>>
    %13 = arith.index_cast %12 : i32 to index
    %c0_9 = arith.constant 0 : index
    %14 = vector.load %arg2[%13, %c0_9] : memref<8x32xf32, #tpu.memory_space<vmem>>, vector<1x32xf32>
    %c3_10 = arith.constant 3 : index
    %c0_11 = arith.constant 0 : index
    %15 = vector.load %arg7[%c3_10, %c0_11] : memref<8x32xf32, #tpu.memory_space<vmem>>, vector<1x32xf32>
    tpu.vector_store %arg7[%c3_10, %c0_11], %14 {strides = array<i32>} : memref<8x32xf32, #tpu.memory_space<vmem>>, vector<1x32xf32>,
    %c4 = arith.constant 4 : index
    %16 = memref.load %arg1[%c4] : memref<8xi32, #tpu.memory_space<smem>>
    %17 = arith.index_cast %16 : i32 to index
    %c0_12 = arith.constant 0 : index
    %18 = vector.load %arg2[%17, %c0_12] : memref<8x32xf32, #tpu.memory_space<vmem>>, vector<1x32xf32>
    %c4_13 = arith.constant 4 : index
    %c0_14 = arith.constant 0 : index
    %19 = vector.load %arg7[%c4_13, %c0_14] : memref<8x32xf32, #tpu.memory_space<vmem>>, vector<1x32xf32>
    tpu.vector_store %arg7[%c4_13, %c0_14], %18 {strides = array<i32>} : memref<8x32xf32, #tpu.memory_space<vmem>>, vector<1x32xf32>,
    %c5 = arith.constant 5 : index
    %20 = memref.load %arg1[%c5] : memref<8xi32, #tpu.memory_space<smem>>
    %21 = arith.index_cast %20 : i32 to index
    %c0_15 = arith.constant 0 : index
    %22 = vector.load %arg2[%21, %c0_15] : memref<8x32xf32, #tpu.memory_space<vmem>>, vector<1x32xf32>
    %c5_16 = arith.constant 5 : index
    %c0_17 = arith.constant 0 : index
    %23 = vector.load %arg7[%c5_16, %c0_17] : memref<8x32xf32, #tpu.memory_space<vmem>>, vector<1x32xf32>
    tpu.vector_store %arg7[%c5_16, %c0_17], %22 {strides = array<i32>} : memref<8x32xf32, #tpu.memory_space<vmem>>, vector<1x32xf32>,
    %c6 = arith.constant 6 : index
    %24 = memref.load %arg1[%c6] : memref<8xi32, #tpu.memory_space<smem>>
    %25 = arith.index_cast %24 : i32 to index
    %c0_18 = arith.constant 0 : index
    %26 = vector.load %arg2[%25, %c0_18] : memref<8x32xf32, #tpu.memory_space<vmem>>, vector<1x32xf32>
    %c6_19 = arith.constant 6 : index
    %c0_20 = arith.constant 0 : index
    %27 = vector.load %arg7[%c6_19, %c0_20] : memref<8x32xf32, #tpu.memory_space<vmem>>, vector<1x32xf32>
    tpu.vector_store %arg7[%c6_19, %c0_20], %26 {strides = array<i32>} : memref<8x32xf32, #tpu.memory_space<vmem>>, vector<1x32xf32>,
    %c7 = arith.constant 7 : index
    %28 = memref.load %arg1[%c7] : memref<8xi32, #tpu.memory_space<smem>>
    %29 = arith.index_cast %28 : i32 to index
    %c0_21 = arith.constant 0 : index
    %30 = vector.load %arg2[%29, %c0_21] : memref<8x32xf32, #tpu.memory_space<vmem>>, vector<1x32xf32>
    %c7_22 = arith.constant 7 : index
    %c0_23 = arith.constant 0 : index
    %31 = vector.load %arg7[%c7_22, %c0_23] : memref<8x32xf32, #tpu.memory_space<vmem>>, vector<1x32xf32>
    tpu.vector_store %arg7[%c7_22, %c0_23], %30 {strides = array<i32>} : memref<8x32xf32, #tpu.memory_space<vmem>>, vector<1x32xf32>,
    %c0_24 = arith.constant 0 : index
    %c0_25 = arith.constant 0 : index
    %32 = vector.load %arg7[%c0_24, %c0_25] : memref<8x32xf32, #tpu.memory_space<vmem>>, vector<8x32xf32>
    %c0_26 = arith.constant 0 : index
    %c0_27 = arith.constant 0 : index
    %33 = vector.load %arg3[%c0_26, %c0_27] : memref<32x128xf32, #tpu.memory_space<vmem>>, vector<32x128xf32>
    %cst = arith.constant dense<0.000000e+00> : vector<8x128xf32>
    %34 = tpu.matmul %32, %33, %cst {dimension_numbers = #tpu.dot_dimension_numbers<[1], [0], [0], [1], [0, 0, 1, 1], [], []>} : vector<8x32xf32>, vector<32x128xf32>, vector<8x128xf32> -> vector<8x128xf32>
    %cst_28 = arith.constant dense<0xFF800000> : vector<8xf32>
    %35 = vector.multi_reduction <maximumf>, %34, %cst_28 [1] : vector<8x128xf32> to vector<8xf32>
    %36 = vector.shape_cast %35 : vector<8xf32> to vector<8x1xf32>
    %37 = vector.broadcast %36 : vector<8x1xf32> to vector<8x128xf32>
    %38 = arith.subf %34, %37 : vector<8x128xf32>
    %39 = math.exp %38 : vector<8x128xf32>
    %cst_29 = arith.constant 0.000000e+00 : f32
    %40 = vector.broadcast %cst_29 : f32 to vector<8x32xf32>
    %41 = vector.extract_strided_slice %39 {offsets = [0, 0], sizes = [8, 32], strides = [1, 1]} : vector<8x128xf32> to vector<8x32xf32>
    %cst_30 = arith.constant dense<0.000000e+00> : vector<8xf32>
    %42 = vector.multi_reduction <add>, %41, %cst_30 [1] : vector<8x32xf32> to vector<8xf32>
    %43 = vector.shape_cast %42 : vector<8xf32> to vector<8x1xf32>
    %44 = vector.broadcast %43 : vector<8x1xf32> to vector<8x32xf32>
    %45 = arith.divf %41, %44 : vector<8x32xf32>
    %46 = arith.addf %40, %45 : vector<8x32xf32>
    %47 = vector.extract_strided_slice %39 {offsets = [0, 32], sizes = [8, 32], strides = [1, 1]} : vector<8x128xf32> to vector<8x32xf32>
    %cst_31 = arith.constant dense<0.000000e+00> : vector<8xf32>
    %48 = vector.multi_reduction <add>, %47, %cst_31 [1] : vector<8x32xf32> to vector<8xf32>
    %49 = vector.shape_cast %48 : vector<8xf32> to vector<8x1xf32>
    %50 = vector.broadcast %49 : vector<8x1xf32> to vector<8x32xf32>
    %51 = arith.divf %47, %50 : vector<8x32xf32>
    %52 = arith.addf %46, %51 : vector<8x32xf32>
    %53 = vector.extract_strided_slice %39 {offsets = [0, 64], sizes = [8, 32], strides = [1, 1]} : vector<8x128xf32> to vector<8x32xf32>
    %cst_32 = arith.constant dense<0.000000e+00> : vector<8xf32>
    %54 = vector.multi_reduction <add>, %53, %cst_32 [1] : vector<8x32xf32> to vector<8xf32>
    %55 = vector.shape_cast %54 : vector<8xf32> to vector<8x1xf32>
    %56 = vector.broadcast %55 : vector<8x1xf32> to vector<8x32xf32>
    %57 = arith.divf %53, %56 : vector<8x32xf32>
    %58 = arith.addf %52, %57 : vector<8x32xf32>
    %59 = vector.extract_strided_slice %39 {offsets = [0, 96], sizes = [8, 32], strides = [1, 1]} : vector<8x128xf32> to vector<8x32xf32>
    %cst_33 = arith.constant dense<0.000000e+00> : vector<8xf32>
    %60 = vector.multi_reduction <add>, %59, %cst_33 [1] : vector<8x32xf32> to vector<8xf32>
    %61 = vector.shape_cast %60 : vector<8xf32> to vector<8x1xf32>
    %62 = vector.broadcast %61 : vector<8x1xf32> to vector<8x32xf32>
    %63 = arith.divf %59, %62 : vector<8x32xf32>
    %64 = arith.addf %58, %63 : vector<8x32xf32>
    %cst_34 = arith.constant 2.500000e-01 : f32
    %65 = vector.broadcast %cst_34 : f32 to vector<8x32xf32>
    %66 = arith.mulf %64, %65 : vector<8x32xf32>
    %cst_35 = arith.constant dense<0xFF800000> : vector<8xf32>
    %67 = vector.multi_reduction <maximumf>, %66, %cst_35 [1] : vector<8x32xf32> to vector<8xf32>
    %68 = vector.shape_cast %67 : vector<8xf32> to vector<8x1xf32>
    %69 = vector.broadcast %68 : vector<8x1xf32> to vector<8x32xf32>
    %70 = arith.subf %66, %69 : vector<8x32xf32>
    %71 = math.exp %70 : vector<8x32xf32>
    %cst_36 = arith.constant dense<0.000000e+00> : vector<8xf32>
    %72 = vector.multi_reduction <add>, %71, %cst_36 [1] : vector<8x32xf32> to vector<8xf32>
    %73 = vector.shape_cast %72 : vector<8xf32> to vector<8x1xf32>
    %74 = vector.broadcast %73 : vector<8x1xf32> to vector<8x32xf32>
    %75 = arith.divf %71, %74 : vector<8x32xf32>
    %c0_37 = arith.constant 0 : index
    %c0_38 = arith.constant 0 : index
    %76 = vector.load %arg4[%c0_37, %c0_38] : memref<32x16xf32, #tpu.memory_space<vmem>>, vector<32x16xf32>
    %cst_39 = arith.constant dense<0.000000e+00> : vector<8x16xf32>
    %77 = tpu.matmul %75, %76, %cst_39 {dimension_numbers = #tpu.dot_dimension_numbers<[1], [0], [0], [1], [0, 0, 1, 1], [], []>} : vector<8x32xf32>, vector<32x16xf32>, vector<8x16xf32> -> vector<8x16xf32>
    %78 = vector.extract_strided_slice %77 {offsets = [0, 0], sizes = [8, 8], strides = [1, 1]} : vector<8x16xf32> to vector<8x8xf32>
    %79 = vector.extract_strided_slice %77 {offsets = [0, 8], sizes = [8, 8], strides = [1, 1]} : vector<8x16xf32> to vector<8x8xf32>
    %cst_40 = arith.constant 0.000000e+00 : f32
    %80 = vector.broadcast %cst_40 : f32 to vector<8x8xf32>
    %81 = arith.maximumf %79, %80 : vector<8x8xf32>
    %82 = vector.broadcast %cst_40 : f32 to vector<8x8xf32>
    %83 = arith.subf %79, %82 : vector<8x8xf32>
    %84 = arith.cmpf one, %83, %83 : vector<8x8xf32>
    %85 = vector.broadcast %cst_40 : f32 to vector<8x8xf32>
    %86 = arith.addf %79, %85 : vector<8x8xf32>
    %87 = math.absf %83 : vector<8x8xf32>
    %cst_41 = arith.constant 0.000000e+00 : f32
    %88 = vector.broadcast %cst_41 : f32 to vector<8x8xf32>
    %89 = arith.subf %88, %87 : vector<8x8xf32>
    %90 = math.exp %89 : vector<8x8xf32>
    %91 = math.log1p %90 : vector<8x8xf32>
    %92 = arith.addf %81, %91 : vector<8x8xf32>
    %93 = arith.select %84, %86, %92 : vector<8x8xi1>, vector<8x8xf32>
    %cst_42 = arith.constant 0.00999999977 : f32
    %94 = vector.broadcast %cst_42 : f32 to vector<8x8xf32>
    %95 = arith.addf %93, %94 : vector<8x8xf32>
    %c0_43 = arith.constant 0 : index
    %c0_44 = arith.constant 0 : index
    %96 = vector.load %arg5[%c0_43, %c0_44] : memref<8x128xf32, #tpu.memory_space<vmem>>, vector<8x128xf32>
    %97 = vector.extract_strided_slice %96 {offsets = [0, 0], sizes = [8, 8], strides = [1, 1]} : vector<8x128xf32> to vector<8x8xf32>
    %98 = arith.mulf %97, %95 : vector<8x8xf32>
    %99 = arith.addf %78, %98 : vector<8x8xf32>
    %100 = tpu.iota {dimensions = array<i32: 1>} : vector<8x8xi32>
    %cst_45 = arith.constant dense<0xFF800000> : vector<8xf32>
    %101 = vector.multi_reduction <maximumf>, %99, %cst_45 [1] : vector<8x8xf32> to vector<8xf32>
    %102 = vector.shape_cast %101 : vector<8xf32> to vector<8x1xf32>
    %103 = vector.broadcast %102 : vector<8x1xf32> to vector<8x8xf32>
    %104 = arith.cmpf oeq, %99, %103 : vector<8x8xf32>
    %c1073741824_i32 = arith.constant 1073741824 : i32
    %105 = vector.broadcast %c1073741824_i32 : i32 to vector<8x8xi32>
    %106 = arith.select %104, %100, %105 : vector<8x8xi1>, vector<8x8xi32>
    %cst_46 = arith.constant dense<2147483647> : vector<8xi32>
    %107 = vector.multi_reduction <minsi>, %106, %cst_46 [1] : vector<8x8xi32> to vector<8xi32>
    %108 = vector.shape_cast %107 : vector<8xi32> to vector<8x1xi32>
    %109 = vector.broadcast %108 : vector<8x1xi32> to vector<8x8xi32>
    %110 = arith.cmpi eq, %100, %109 : vector<8x8xi32>
    %cst_47 = arith.constant 0xFF800000 : f32
    %111 = vector.broadcast %cst_47 : f32 to vector<8x8xf32>
    %112 = arith.select %110, %111, %99 : vector<8x8xi1>, vector<8x8xf32>
    %cst_48 = arith.constant dense<0xFF800000> : vector<8xf32>
    %113 = vector.multi_reduction <maximumf>, %112, %cst_48 [1] : vector<8x8xf32> to vector<8xf32>
    %114 = vector.shape_cast %113 : vector<8xf32> to vector<8x1xf32>
    %115 = vector.broadcast %114 : vector<8x1xf32> to vector<8x8xf32>
    %116 = arith.cmpf oeq, %112, %115 : vector<8x8xf32>
    %c1073741824_i32_49 = arith.constant 1073741824 : i32
    %117 = vector.broadcast %c1073741824_i32_49 : i32 to vector<8x8xi32>
    %118 = arith.select %116, %100, %117 : vector<8x8xi1>, vector<8x8xi32>
    %cst_50 = arith.constant dense<2147483647> : vector<8xi32>
    %119 = vector.multi_reduction <minsi>, %118, %cst_50 [1] : vector<8x8xi32> to vector<8xi32>
    %120 = vector.shape_cast %119 : vector<8xi32> to vector<8x1xi32>
    %121 = arith.subf %114, %102 : vector<8x1xf32>
    %122 = math.exp %121 : vector<8x1xf32>
    %cst_51 = arith.constant 1.000000e+00 : f32
    %123 = vector.broadcast %cst_51 : f32 to vector<8x1xf32>
    %124 = arith.addf %123, %122 : vector<8x1xf32>
    %125 = tpu.reciprocal %124 {approx = true} : vector<8x1xf32> -> vector<8x1xf32>
    %126 = arith.mulf %122, %125 : vector<8x1xf32>
    %127 = tpu.iota {dimensions = array<i32: 1>} : vector<8x128xi32>
    %128 = tpu.iota {dimensions = array<i32: 0>} : vector<8x128xi32>
    %129 = vector.broadcast %108 : vector<8x1xi32> to vector<8x128xi32>
    %130 = arith.cmpi eq, %127, %129 : vector<8x128xi32>
    %cst_52 = arith.constant 0.000000e+00 : f32
    %131 = vector.shape_cast %125 : vector<8x1xf32> to vector<8x1xf32>
    %132 = vector.broadcast %131 : vector<8x1xf32> to vector<8x128xf32>
    %133 = vector.broadcast %cst_52 : f32 to vector<8x128xf32>
    %134 = arith.select %130, %132, %133 : vector<8x128xi1>, vector<8x128xf32>
    %135 = vector.broadcast %120 : vector<8x1xi32> to vector<8x128xi32>
    %136 = arith.cmpi eq, %127, %135 : vector<8x128xi32>
    %cst_53 = arith.constant 0.000000e+00 : f32
    %137 = vector.shape_cast %126 : vector<8x1xf32> to vector<8x1xf32>
    %138 = vector.broadcast %137 : vector<8x1xf32> to vector<8x128xf32>
    %139 = vector.broadcast %cst_53 : f32 to vector<8x128xf32>
    %140 = arith.select %136, %138, %139 : vector<8x128xi1>, vector<8x128xf32>
    %141 = arith.addf %134, %140 : vector<8x128xf32>
    %c4_i32 = arith.constant 4 : i32
    %142 = vector.broadcast %c4_i32 : i32 to vector<8x128xi32>
    %143 = arith.cmpi slt, %128, %142 : vector<8x128xi32>
    %cst_54 = arith.constant 0.000000e+00 : f32
    %144 = vector.broadcast %cst_54 : f32 to vector<8x128xf32>
    %145 = arith.select %143, %141, %144 : vector<8x128xi1>, vector<8x128xf32>
    %cst_55 = arith.constant dense<0.000000e+00> : vector<128xf32>
    %146 = vector.multi_reduction <add>, %145, %cst_55 [0] : vector<8x128xf32> to vector<128xf32>
    %147 = vector.shape_cast %146 : vector<128xf32> to vector<1x128xf32>
    %148 = vector.shape_cast %147 : vector<1x128xf32> to vector<1x128xf32>
    %149 = vector.broadcast %148 : vector<1x128xf32> to vector<8x128xf32>
    %150 = tpu.concatenate %145, %149 in 0 : vector<8x128xf32>, vector<8x128xf32> -> vector<16x128xf32>
    %c0_56 = arith.constant 0 : index
    %c0_57 = arith.constant 0 : index
    %151 = vector.load %arg6[%c0_56, %c0_57] : memref<16x128xf32, #tpu.memory_space<vmem>>, vector<16x128xf32>
    tpu.vector_store %arg6[%c0_56, %c0_57], %150 {strides = array<i32>} : memref<16x128xf32, #tpu.memory_space<vmem>>, vector<16x128xf32>,
    return
  }
  func.func @transform_0(%arg0: i32, %arg1: memref<8xi32, #tpu.memory_space<smem>>) -> (i32, i32) {
    %c0_i32 = arith.constant 0 : i32
    %c0_i32_0 = arith.constant 0 : i32
    %c0_i32_1 = arith.constant 0 : i32
    return %c0_i32, %c0_i32_0 : i32, i32
  }
  func.func @transform_1(%arg0: i32, %arg1: memref<8xi32, #tpu.memory_space<smem>>) -> (i32, i32) {
    %c0_i32 = arith.constant 0 : i32
    %c0_i32_0 = arith.constant 0 : i32
    %c0_i32_1 = arith.constant 0 : i32
    return %c0_i32, %c0_i32_0 : i32, i32
  }
  func.func @transform_2(%arg0: i32, %arg1: memref<8xi32, #tpu.memory_space<smem>>) -> (i32, i32) {
    %c0_i32 = arith.constant 0 : i32
    %c0_i32_0 = arith.constant 0 : i32
    %c0_i32_1 = arith.constant 0 : i32
    return %c0_i32, %c0_i32_0 : i32, i32
  }
  func.func @transform_3(%arg0: i32, %arg1: memref<8xi32, #tpu.memory_space<smem>>) -> (i32, i32) {
    %c0_i32 = arith.constant 0 : i32
    %c0_i32_0 = arith.constant 0 : i32
    %c0_i32_1 = arith.constant 0 : i32
    return %c0_i32, %c0_i32_0 : i32, i32
  }
  func.func @transform_4(%arg0: i32, %arg1: memref<8xi32, #tpu.memory_space<smem>>) -> (i32, i32) {
    %c0_i32 = arith.constant 0 : i32
    %c0_i32_0 = arith.constant 0 : i32
    %c0_i32_1 = arith.constant 0 : i32
    return %c0_i32, %c0_i32_0 : i32, i32
  }
}

</mosaic_0001>

<bundles_post_ra>
// kernel: tpu_custom_call.1
= control target key start
LH: loop header
LB: loop body
LE: loop exit
PB: predicated region body
PF: predicated region fallthrough
CT: control target
= control target key end

     0   :  { %s442_s21 = smov [#allocation4]   ;;  %s575_s0 = inlined_call_operand.vmem [shape: s32[8], index: 0, kind: input, shape index: {}]   ;;  %s576_s1 = inlined_call_operand.vmem [shape: f32[8,32], index: 1, kind: input, shape index: {}]   ;;  %s577_s2 = inlined_call_operand.vmem [shape: f32[32,128], index: 2, kind: input, shape index: {}]   ;;  %s578_s3 = inlined_call_operand.vmem [shape: f32[32,16], index: 3, kind: input, shape index: {}]   ;;  %s579_s4 = inlined_call_operand.vmem [shape: f32[8,128], index: 4, kind: input, shape index: {}]   ;;  %s580_s5 = inlined_call_operand.hbm [shape: f32[16,128], index: 5, kind: output, shape index: {}]  }
   0x1   :  { %s11_s20 = sshll.u32 %s575_s0, 4  ;;  %s12_s20 = int_to_ptr.vmem [resolvable:$true] %s11_s20 }
   0x2   :  { %14 = dma.vmem_to_smem %s12_s20, 16, %s442_s21, [#allocation3] }
   0x3   :  { %438 = dma.done.wait [#allocation3], 16 }
   0x4   :  { %439 = vsyncadd [#allocation3], 4294967280 }
   0x5   :  { %17 = sfence }
   0x6   :  { %v64_v0 = vld [vmem:[%s577_s2 + $0x18] sm:$0xff]  ;;  %v63_v1 = vld [vmem:[%s577_s2 + $0x10] sm:$0xff]  ;;  %s27_s26 = sld [smem:[#allocation4]] }
   0x7   :  { %81 = vmatpush.msra.mxu0 %v64_v0  ;;  %s363_s27 = sld [smem:[#allocation4 + $0x1]] }
   0x8   :  { %18 = vsyncpa [#allocation6], 0  ;;  %v62_v2 = vld [vmem:[%s577_s2 + $0x8] sm:$0xff]  ;;  %s364_s29 = sld [smem:[#allocation4 + $0x2]]  ;;  %v61_v3 = vld [vmem:[%s577_s2] sm:$0xff]  ;;  %vm30_vm0 = vcmask 253952  }
   0x9   :  { %82 = vmatpush.msra.mxu0 %v63_v1  ;;  %s365_s30 = sld [smem:[#allocation4 + $0x3]]  ;;  %vm65_vm1 = vcmask 261120   ;;  %s445_s10 = smov 32  }
   0xa   :  { %s366_s8 = sld [smem:[#allocation4 + $0x4]]  ;;  %s343_s23 = sshll.u32 %s580_s5, 4  ;;  %s344_s23 = int_to_ptr.hbm [resolvable:$true] %s343_s23 }
   0xb   :  { %83 = vmatpush.msra.mxu0 %v62_v2  ;;  %s367_s9 = sld [smem:[#allocation4 + $0x5]]  ;;  %s448_s24 = smov 128  }
   0xc   :  { %s28_s12 = scalar_lea.vmem %s576_s1, %s27_s26  ;;  %s368_s13 = sld [smem:[#allocation4 + $0x6]] }
   0xd   :  { %84 = vmatpush.msra.mxu0 %v61_v3  ;;  %v29_v4 = vld [vmem:[%s28_s12] sm:$0x1]  ;;  %s33_s16 = scalar_lea.vmem %s576_s1, %s363_s27  ;;  %s369_s17 = sld [smem:[#allocation4 + $0x7]] }
   0xe   :  { %31 = vst.msk [vmem:[#allocation2] sm:$0x1] %vm30_vm0, %v29_v4  ;;  %v34_v5 = vld [vmem:[%s33_s16] sm:$0x1]  ;;  %s37_s19 = scalar_lea.vmem %s576_s1, %s364_s29 }
   0xf   :  { %35 = vst.msk [vmem:[#allocation2 + $0x1] sm:$0x1] %vm30_vm0, %v34_v5  ;;  %v38_v6 = vld [vmem:[%s37_s19] sm:$0x1]  ;;  %s41_s22 = scalar_lea.vmem %s576_s1, %s365_s30 }
  0x10   :  { %39 = vst.msk [vmem:[#allocation2 + $0x2] sm:$0x1] %vm30_vm0, %v38_v6  ;;  %v42_v7 = vld [vmem:[%s41_s22] sm:$0x1]  ;;  %s45_s25 = scalar_lea.vmem %s576_s1, %s366_s8 }
  0x11   :  { %43 = vst.msk [vmem:[#allocation2 + $0x3] sm:$0x1] %vm30_vm0, %v42_v7  ;;  %v46_v8 = vld [vmem:[%s45_s25] sm:$0x1]  ;;  %s49_s28 = scalar_lea.vmem %s576_s1, %s367_s9  ;;  %s443_s9 = smov 64  }
  0x12   :  { %47 = vst.msk [vmem:[#allocation2 + $0x4] sm:$0x1] %vm30_vm0, %v46_v8  ;;  %v50_v9 = vld [vmem:[%s49_s28] sm:$0x1]  ;;  %s53_s30 = scalar_lea.vmem %s576_s1, %s368_s13  ;;  %s449_s25 = smov 8  }
  0x13   :  { %51 = vst.msk [vmem:[#allocation2 + $0x5] sm:$0x1] %vm30_vm0, %v50_v9  ;;  %v54_v10 = vld [vmem:[%s53_s30] sm:$0x1]  ;;  %s57_s8 = scalar_lea.vmem %s576_s1, %s369_s17  ;;  %s444_s1 = smov 96  }
  0x14   :  { %55 = vst.msk [vmem:[#allocation2 + $0x6] sm:$0x1] %vm30_vm0, %v54_v10  ;;  %v58_v11 = vld [vmem:[%s57_s8] sm:$0x1] }
  0x15   :  { %59 = vst.msk [vmem:[#allocation2 + $0x7] sm:$0x1] %vm30_vm0, %v58_v11 }
  0x1c   :  { %v60_v12 = vld [vmem:[#allocation2] sm:$0xff] }
  0x1d   :  { %370 = vmatmul.msk.f32.vlgmr.msra.gmra.mxu0 %vm65_vm1, %v60_v12 }
  0x9a   :  { %v86_v13 = vpop.f32.mrf.mxu0 }
  0x9b   :  { %89 = vmax.xlane.f32.xlu0 %v86_v13 }
 0x10e   :  { %v90_v14 = vpop.xlane.xlu0 %89 }
 0x10f   :  { %v91_v15 = vsub.f32 %v86_v13, %v90_v14 }
 0x111   :  { %v92_v16 = vmul.f32 1.442695, %v91_v15 }
 0x113   :  { %380 = vpow2.f32 %v92_v16 }
 0x119   :  { %v528_v17 = vpop.eup %380 }
 0x11a   :  { %140 = vrot.lane.b32.xlu1 %v528_v17, %s443_s9  ;;  %114 = vrot.lane.b32.xlu0 %v528_v17, %s444_s1  ;;  %v94_v24 = vsel %vm65_vm1, %v528_v17, 0.0 }
 0x122   :  { %166 = vrot.lane.b32.xlu1 %v528_v17, %s445_s10 }
 0x18c   :  { %v141_v18 = vpop.permute.xlu1 %140  ;;  %v115_v19 = vpop.permute.xlu0 %114 }
 0x18d   :  { %v117_v20 = vsel %vm65_vm1, %v115_v19, 0.0  ;;  %v143_v23 = vsel %vm65_vm1, %v141_v18, 0.0 }
 0x18e   :  { %118 = vadd.xlane.f32.xlu2 %v117_v20 }
 0x194   :  { %v167_v21 = vpop.permute.xlu1 %166 }
 0x195   :  { %v169_v22 = vsel %vm65_vm1, %v167_v21, 0.0 }
 0x196   :  { %170 = vadd.xlane.f32.xlu1 %v169_v22  ;;  %144 = vadd.xlane.f32.xlu2 %v143_v23  ;;  %v219_v23 = vld [vmem:[%s578_s3 + $0x10] sm:$0xff] }
 0x19e   :  { %95 = vadd.xlane.f32.xlu2 %v94_v24  ;;  %v218_v24 = vld [vmem:[%s578_s3 + $0x8] sm:$0xff] }
 0x201   :  { %v119_v25 = vpop.xlane.xlu2 %118 }
 0x202   :  { %382 = vrcp.f32 %v119_v25  ;;  %v131_v31 = vand.u32 2147483648, %v119_v25  ;;  %v129_v33 = vand.u32 2147483647, %v119_v25  ;;  %vm125_vm3 = vweird.f32 %v119_v25 }
 0x204   :  { %v132_v36 = vor.u32 1.1754944e-38, %v131_v31  ;;  %vm130_vm5 = vcmp.eq.f32.partialorder %v129_v33, 8.507059e+37 }
 0x208   :  { %v383_v26 = vpop.eup %382 }
 0x209   :  { %v121_v27 = vmul.f32 %v383_v26, %v119_v25  ;;  %v171_v28 = vpop.xlane.xlu1 %170  ;;  %v145_v29 = vpop.xlane.xlu2 %144  ;;  %vm126_vm2 = vweird.f32 %v383_v26  ;;  %v217_v25 = vld [vmem:[%s578_s3] sm:$0xff] }
 0x20a   :  { %384 = vrcp.f32 %v171_v28  ;;  %vm127_vm4 = vmor %vm125_vm3, %vm126_vm2  ;;  %v157_v45 = vand.u32 2147483648, %v145_v29  ;;  %v155_v48 = vand.u32 2147483647, %v145_v29  ;;  %vm151_vm7 = vweird.f32 %v145_v29 }
 0x20b   :  { %v122_v30 = vsub.f32 1.0, %v121_v27  ;;  %386 = vrcp.f32 %v145_v29  ;;  %v183_v53 = vand.u32 2147483648, %v171_v28  ;;  %vm177_vm11 = vweird.f32 %v171_v28 }
 0x20c   :  { %v158_v50 = vor.u32 1.1754944e-38, %v157_v45  ;;  %vm156_vm9 = vcmp.eq.f32.partialorder %v155_v48, 8.507059e+37  ;;  %v181_v56 = vand.u32 2147483647, %v171_v28 }
 0x20d   :  { %v123_v32 = vmul.f32 %v383_v26, %v122_v30  ;;  %v184_v58 = vor.u32 1.1754944e-38, %v183_v53 }
 0x20e   :  { %vm182_vm13 = vcmp.eq.f32.partialorder %v181_v56, 8.507059e+37 }
 0x20f   :  { %v124_v34 = vadd.f32 %v383_v26, %v123_v32 }
 0x210   :  { %v385_v35 = vpop.eup %384 }
 0x211   :  { %v387_v37 = vpop.eup %386  ;;  %v173_v38 = vmul.f32 %v385_v35, %v171_v28  ;;  %v128_v39 = vsel %vm127_vm4, %v383_v26, %v124_v34  ;;  %vm178_vm10 = vweird.f32 %v385_v35  ;;  %v96_v61 = vpop.xlane.xlu2 %95 }
 0x212   :  { %v147_v40 = vmul.f32 %v387_v37, %v145_v29  ;;  %v133_v41 = vsel %vm130_vm5, %v132_v36, %v128_v39  ;;  %vm152_vm6 = vweird.f32 %v387_v37  ;;  %vm179_vm12 = vmor %vm177_vm11, %vm178_vm10  ;;  %388 = vrcp.f32 %v96_v61 }
 0x213   :  { %v174_v42 = vsub.f32 1.0, %v173_v38  ;;  %v134_v43 = vmul.f32 %v528_v17, %v133_v41  ;;  %vm153_vm8 = vmor %vm151_vm7, %vm152_vm6  ;;  %v108_v3 = vand.u32 2147483648, %v96_v61  ;;  %vm102_vm15 = vweird.f32 %v96_v61 }
 0x214   :  { %v148_v44 = vsub.f32 1.0, %v147_v40  ;;  %v106_v4 = vand.u32 2147483647, %v96_v61 }
 0x215   :  { %136 = vrot.lane.b32.xlu2 %v134_v43, %s444_s1  ;;  %v175_v46 = vmul.f32 %v385_v35, %v174_v42  ;;  %v109_v6 = vor.u32 1.1754944e-38, %v108_v3 }
 0x216   :  { %v149_v47 = vmul.f32 %v387_v37, %v148_v44  ;;  %vm107_vm2 = vcmp.eq.f32.partialorder %v106_v4, 8.507059e+37 }
 0x217   :  { %v176_v52 = vadd.f32 %v385_v35, %v175_v46 }
 0x218   :  { %v150_v49 = vadd.f32 %v387_v37, %v149_v47  ;;  %v389_v62 = vpop.eup %388 }
 0x219   :  { %v180_v57 = vsel %vm179_vm12, %v385_v35, %v176_v52  ;;  %v98_v63 = vmul.f32 %v389_v62, %v96_v61  ;;  %vm103_vm14 = vweird.f32 %v389_v62 }
 0x21a   :  { %v154_v51 = vsel %vm153_vm8, %v387_v37, %v150_v49  ;;  %v185_v59 = vsel %vm182_vm13, %v184_v58, %v180_v57  ;;  %vm104_vm0 = vmor %vm102_vm15, %vm103_vm14 }
 0x21b   :  { %v159_v54 = vsel %vm156_vm9, %v158_v50, %v154_v51  ;;  %v186_v60 = vmul.f32 %v528_v17, %v185_v59  ;;  %v99_v0 = vsub.f32 1.0, %v98_v63 }
 0x21c   :  { %v160_v55 = vmul.f32 %v528_v17, %v159_v54 }
 0x21d   :  { %v100_v1 = vmul.f32 %v389_v62, %v99_v0 }
 0x21e   :  { %162 = vrot.lane.b32.xlu0 %v160_v55, %s443_s9  ;;  %v263_v55 = vld [vmem:[%s579_s4] sm:$0xff]  ;;  %s447_s4 = smov [#allocation5]  }
 0x21f   :  { %v101_v2 = vadd.f32 %v389_v62, %v100_v1  ;;  %s341_s20 = sshll.u32 %s447_s4, 4  ;;  %s342_s20 = int_to_ptr.vmem [resolvable:$true] %s341_s20 }
 0x221   :  { %v105_v5 = vsel %vm104_vm0, %v389_v62, %v101_v2 }
 0x222   :  { %v110_v7 = vsel %vm107_vm2, %v109_v6, %v105_v5 }
 0x223   :  { %v111_v10 = vmul.f32 %v528_v17, %v110_v7  ;;  %v220_v17 = vld [vmem:[%s578_s3 + $0x18] sm:$0xff]  ;;  %s446_s3 = smov 120  }
 0x224   :  { %236 = vmatpush.msra.mxu1 %v220_v17 }
 0x226   :  { %188 = vrot.lane.b32.xlu0 %v186_v60, %s445_s10  ;;  %237 = vmatpush.msra.mxu1 %v219_v23  ;;  %v270_v60 = vlaneseq }
 0x228   :  { %238 = vmatpush.msra.mxu1 %v218_v24  ;;  %v271_v61 = vand.u32 127, %v270_v60 }
 0x22a   :  { %239 = vmatpush.msra.mxu1 %v217_v25 }
 0x26f   :  { %v137_v9 = vpop.permute.xlu2 %136 }
 0x270   :  { %v139_v11 = vadd.f32 %v137_v9, %v111_v10 }
 0x290   :  { %v163_v8 = vpop.permute.xlu0 %162 }
 0x291   :  { %v165_v12 = vadd.f32 %v163_v8, %v139_v11 }
 0x298   :  { %v189_v13 = vpop.permute.xlu0 %188 }
 0x299   :  { %v191_v14 = vadd.f32 %v189_v13, %v165_v12 }
 0x29b   :  { %v192_v15 = vmul.f32 0.25, %v191_v14 }
 0x29d   :  { %v193_v16 = vsel %vm65_vm1, %v192_v15, -inf }
 0x29e   :  { %194 = vmax.xlane.f32.xlu0 %v193_v16 }
 0x311   :  { %v195_v18 = vpop.xlane.xlu0 %194 }
 0x312   :  { %v196_v19 = vsub.f32 %v192_v15, %v195_v18 }
 0x314   :  { %v197_v20 = vmul.f32 1.442695, %v196_v19 }
 0x316   :  { %390 = vpow2.f32 %v197_v20 }
 0x31c   :  { %v391_v21 = vpop.eup %390 }
 0x31d   :  { %v199_v22 = vsel %vm65_vm1, %v391_v21, 0.0 }
 0x31e   :  { %200 = vadd.xlane.f32.xlu2 %v199_v22 }
 0x391   :  { %v201_v26 = vpop.xlane.xlu2 %200 }
 0x392   :  { %392 = vrcp.f32 %v201_v26  ;;  %v213_v30 = vand.u32 2147483648, %v201_v26  ;;  %v211_v32 = vand.u32 2147483647, %v201_v26  ;;  %vm207_vm4 = vweird.f32 %v201_v26 }
 0x394   :  { %v214_v34 = vor.u32 1.1754944e-38, %v213_v30  ;;  %vm212_vm6 = vcmp.eq.f32.partialorder %v211_v32, 8.507059e+37  ;;  %v322_v32 = vshrl.u32 %v270_v60, 7 }
 0x396   :  { %vm327_vm15 = vcmp.lt.s32.totalorder %v322_v32, 4 }
 0x398   :  { %v393_v27 = vpop.eup %392 }
 0x399   :  { %v203_v28 = vmul.f32 %v393_v27, %v201_v26  ;;  %vm208_vm3 = vweird.f32 %v393_v27 }
 0x39a   :  { %vm209_vm5 = vmor %vm207_vm4, %vm208_vm3 }
 0x39b   :  { %v204_v29 = vsub.f32 1.0, %v203_v28 }
 0x39d   :  { %v205_v31 = vmul.f32 %v393_v27, %v204_v29 }
 0x39f   :  { %v206_v33 = vadd.f32 %v393_v27, %v205_v31 }
 0x3a1   :  { %v210_v35 = vsel %vm209_vm5, %v393_v27, %v206_v33 }
 0x3a2   :  { %v215_v36 = vsel %vm212_vm6, %v214_v34, %v210_v35 }
 0x3a3   :  { %v216_v37 = vmul.f32 %v391_v21, %v215_v36 }
 0x3a5   :  { %371 = vmatmul.msk.f32.vlgmr.msra.gmra.mxu1 %vm65_vm1, %v216_v37  ;;  %vm272_vm1 = vcmask 64512  }
 0x422   :  { %v241_v38 = vpop.f32.mrf.mxu1 }
 0x423   :  { %v247_v39 = vand.u32 2147483647, %v241_v38  ;;  %v244_v50 = vmax.f32 %v241_v38, 0.0  ;;  %vm245_vm8 = vcmp.ne.f32.partialorder %v241_v38, %v241_v38 }
 0x425   :  { %v248_v40 = vsub.f32 0.0, %v247_v39 }
 0x427   :  { %v249_v41 = vmul.f32 1.442695, %v248_v40 }
 0x429   :  { %394 = vpow2.f32 %v249_v41 }
 0x42f   :  { %v395_v42 = vpop.eup %394 }
 0x430   :  { %v251_v43 = vadd.f32 1.0, %v395_v42  ;;  %v254_v44 = vmul.f32 -0.5, %v395_v42  ;;  %v257_v46 = vand.u32 2147483647, %v395_v42 }
 0x432   :  { %396 = vlog2.f32 %v251_v43  ;;  %v255_v45 = vadd.f32 1.0, %v254_v44  ;;  %vm258_vm7 = vcmp.lt.f32.partialorder %v257_v46, 0.0004427343 }
 0x434   :  { %v256_v49 = vmul.f32 %v395_v42, %v255_v45 }
 0x438   :  { %v397_v47 = vpop.eup %396 }
 0x439   :  { %v253_v48 = vmul.f32 0.6931472, %v397_v47 }
 0x43b   :  { %v259_v51 = vsel %vm258_vm7, %v256_v49, %v253_v48 }
 0x43c   :  { %v260_v52 = vadd.f32 %v259_v51, %v244_v50 }
 0x43e   :  { %v261_v53 = vsel %vm245_vm8, %v241_v38, %v260_v52 }
 0x43f   :  { %v262_v54 = vadd.f32 0.01, %v261_v53 }
 0x441   :  { %265 = vrot.lane.b32.xlu1 %v262_v54, %s446_s3 }
 0x4b3   :  { %v266_v56 = vpop.permute.xlu1 %265 }
 0x4b4   :  { %v268_v57 = vmul.f32 %v266_v56, %v263_v55 }
 0x4b6   :  { %v269_v58 = vadd.f32 %v268_v57, %v241_v38 }
 0x4b8   :  { %v273_v59 = vsel %vm272_vm1, %v269_v58, -inf }
 0x4b9   :  { %274 = vmax.xlane.f32.xlu1 %v273_v59 }
 0x52c   :  { %v275_v62 = vpop.xlane.xlu1 %274 }
 0x52d   :  { %vm276_vm9 = vcmp.eq.f32.partialorder %v269_v58, %v275_v62 }
 0x52e   :  { %v277_v63 = vsel %vm276_vm9, %v271_v61, 1073741824 }
 0x52f   :  { %v278_v0 = vsel %vm272_vm1, %v277_v63, 2147483647 }
 0x530   :  { %v280_v1 = vshra.s32 %v278_v0, 16  ;;  %v279_v3 = vand.u32 65535, %v278_v0 }
 0x532   :  { %v282_v2 = vcvt.s32.f32 %v280_v1  ;;  %v281_v5 = vcvt.s32.f32 %v279_v3 }
 0x534   :  { %283 = vmin.xlane.f32.xlu0 %v282_v2 }
 0x5a7   :  { %v284_v4 = vpop.xlane.xlu0 %283 }
 0x5a8   :  { %vm285_vm10 = vcmp.eq.f32.partialorder %v282_v2, %v284_v4  ;;  %v290_v7 = vcvt.f32.s32 %v284_v4 }
 0x5a9   :  { %v286_v6 = vsel %vm285_vm10, %v281_v5, inf }
 0x5aa   :  { %287 = vmin.xlane.f32.xlu2 %v286_v6  ;;  %v291_v9 = vshll.u32 %v290_v7, 16 }
 0x61d   :  { %v288_v8 = vpop.xlane.xlu2 %287 }
 0x61e   :  { %v289_v10 = vcvt.f32.s32 %v288_v8 }
 0x620   :  { %v292_v11 = vadd.s32 %v291_v9, %v289_v10 }
 0x622   :  { %vm293_vm11 = vcmp.eq.s32.totalorder %v271_v61, %v292_v11 }
 0x623   :  { %v294_v12 = vsel %vm293_vm11, -inf, %v269_v58 }
 0x624   :  { %v295_v13 = vsel %vm272_vm1, %v294_v12, -inf }
 0x625   :  { %296 = vmax.xlane.f32.xlu0 %v295_v13 }
 0x698   :  { %v297_v14 = vpop.xlane.xlu0 %296 }
 0x699   :  { %vm298_vm12 = vcmp.eq.f32.partialorder %v294_v12, %v297_v14  ;;  %v315_v23 = vsub.f32 %v297_v14, %v275_v62 }
 0x69a   :  { %v299_v15 = vsel %vm298_vm12, %v271_v61, 1073741824 }
 0x69b   :  { %v300_v16 = vsel %vm272_vm1, %v299_v15, 2147483647  ;;  %v316_v24 = vmul.f32 1.442695, %v315_v23 }
 0x69c   :  { %v302_v18 = vshra.s32 %v300_v16, 16  ;;  %v301_v20 = vand.u32 65535, %v300_v16 }
 0x69d   :  { %398 = vpow2.f32 %v316_v24 }
 0x69e   :  { %v304_v19 = vcvt.s32.f32 %v302_v18  ;;  %v303_v22 = vcvt.s32.f32 %v301_v20 }
 0x6a0   :  { %305 = vmin.xlane.f32.xlu2 %v304_v19 }
 0x6a3   :  { %v399_v25 = vpop.eup %398 }
 0x6a4   :  { %v318_v26 = vadd.f32 1.0, %v399_v25 }
 0x6a6   :  { %400 = vrcp.f32 %v318_v26 }
 0x6ac   :  { %v401_v29 = vpop.eup %400 }
 0x6ad   :  { %v320_v34 = vmul.f32 %v401_v29, %v399_v25  ;;  %v323_v35 = vsel %vm293_vm11, %v401_v29, 0.0 }
 0x713   :  { %v306_v21 = vpop.xlane.xlu2 %305 }
 0x714   :  { %vm307_vm13 = vcmp.eq.f32.partialorder %v304_v19, %v306_v21  ;;  %v312_v27 = vcvt.f32.s32 %v306_v21 }
 0x715   :  { %v308_v17 = vsel %vm307_vm13, %v303_v22, inf }
 0x716   :  { %309 = vmin.xlane.f32.xlu0 %v308_v17  ;;  %v313_v30 = vshll.u32 %v312_v27, 16 }
 0x789   :  { %v310_v28 = vpop.xlane.xlu0 %309 }
 0x78a   :  { %v311_v31 = vcvt.f32.s32 %v310_v28 }
 0x78c   :  { %v314_v33 = vadd.s32 %v313_v30, %v311_v31 }
 0x78e   :  { %vm324_vm14 = vcmp.eq.s32.totalorder %v271_v61, %v314_v33 }
 0x78f   :  { %v325_v36 = vsel %vm324_vm14, %v320_v34, 0.0 }
 0x790   :  { %v326_v37 = vadd.f32 %v325_v36, %v323_v35 }
 0x792   :  { %v328_v38 = vsel %vm327_vm15, %v326_v37, 0.0 }
 0x793   :  { %v329_v39 = vrot.slane %v328_v38, 4  ;;  %335 = vst [vmem:[#allocation5] sm:$0xff] %v328_v38 }
 0x795   :  { %v330_v40 = vadd.f32 %v329_v39, %v328_v38 }
 0x797   :  { %v331_v41 = vrot.slane %v330_v40, 2 }
 0x799   :  { %v332_v42 = vadd.f32 %v331_v41, %v330_v40 }
 0x79b   :  { %v333_v43 = vrot.slane %v332_v42, 1 }
 0x79d   :  { %v334_v44 = vadd.f32 %v333_v43, %v332_v42 }
 0x79f   :  { %336 = vst [vmem:[#allocation5 + $0x8] sm:$0xff] %v334_v44 }
 0x7a0   :  { %349 = dma.vmem_to_hbm [thread:$0]  %s342_s20, 256, %s344_s23, [#allocation6], %s448_s24, %s448_s24, %s449_s25  }
 0x7a1   :  { %440 = dma.done.wait [#allocation6], 256  }
 0x7a2   :  { %441 = vsyncadd [#allocation6], 4294967040 }
 0x7a3   :  { %354 = vsyncpa [#allocation6], 1 }

</bundles_post_ra>
